<compile_context>
chip_gen: v7x
topology: tpu7x:2x2x1
jax: 0.10.0
libtpu: 0.0.40
codegen_flags: <defaults>
</compile_context>

<pallas_src>
import functools
import math

import jax
import jax.numpy as jnp
from jax import lax
from jax.experimental import pallas as pl
from jax.experimental.pallas import tpu as pltpu


def _bce_tile_kernel(padding_value, n_valid_rows, n_valid_cols, mask_rows, mask_cols,
                     pred_ref, tgt_ref, cw_ref, out_ref):
    # Stream native dtypes; do all math in f32 on the VPU/EUP.
    x = pred_ref[...].astype(jnp.float32)          # (TB, TC) logits
    t = tgt_ref[...].astype(jnp.int32)             # (TB, TC) integer targets
    y = t.astype(jnp.float32)

    # Numerically-stable BCE-with-logits (same formulation as torch):
    #   max(x, 0) - x*y + log1p(exp(-|x|))
    loss = jnp.maximum(x, 0.0) - x * y + jnp.log1p(jnp.exp(-jnp.abs(x)))

    # class_weights applied only on positive targets; (1, TC) broadcasts over rows.
    w = jnp.where(t == 1, cw_ref[...], jnp.float32(1.0))

    # Bug-compatible mask: element kept unless (~t) == padding_value.
    keep = (~t) != padding_value

    tb, tc = x.shape
    if mask_rows:   # last row-tile overruns the array: mask garbage rows
        rows = pl.program_id(0) * tb + lax.broadcasted_iota(jnp.int32, (tb, tc), 0)
        keep = keep & (rows < n_valid_rows)
    if mask_cols:   # last lane-tile overruns the array: mask garbage columns
        cols = pl.program_id(1) * tc + lax.broadcasted_iota(jnp.int32, (tb, tc), 1)
        keep = keep & (cols < n_valid_cols)

    # NaN-safe masking of (possibly garbage) edge data: select, don't multiply.
    s = jnp.sum(jnp.where(keep, loss * w, jnp.float32(0.0)))
    n = jnp.sum(jnp.where(keep, jnp.float32(1.0), jnp.float32(0.0)))

    # Full, unmasked (8,128) lane-dense partial-result store:
    #   [0,0] = partial sum, [0,1] = partial count, rest zeros.
    sub = lax.broadcasted_iota(jnp.int32, (8, 128), 0)
    lane = lax.broadcasted_iota(jnp.int32, (8, 128), 1)
    out_ref[...] = jnp.where((sub == 0) & (lane == 0), jnp.full((8, 128), s),
                             jnp.where((sub == 0) & (lane == 1), jnp.full((8, 128), n),
                                       jnp.float32(0.0)))


def bce_with_logits_loss(pred, target, class_weights=None, padding_value=-100,
                         *, vmem_io_budget_bytes=20 * 1024 * 1024,
                         max_tile_rows=None, max_tile_cols=8192):
    """pred: (B, C) float logits (any float dtype), target: (B, C) int labels
    (0/1 + padding), class_weights: (C,) float or None.
    Returns the scalar masked-mean loss (bug-compatible with the torch module)."""
    B, C = pred.shape
    assert jnp.issubdtype(target.dtype, jnp.integer), "target must be an integer tensor"

    if class_weights is None:
        cw = jnp.ones((C,), jnp.float32)
    else:
        cw = jnp.asarray(class_weights, jnp.float32).reshape(C)

    # Lane-dense regrouping only when it's a free (bitcast) reshape:
    # pack g batch rows into one physical row of width C2 = g*C (multiple of 128).
    g = 128 // math.gcd(C, 128)
    if g > 1 and B % g == 0:
        B2, C2 = B // g, g * C
        pred2 = pred.reshape(B2, C2)
        tgt2 = target.reshape(B2, C2)
        cw2 = jnp.tile(cw, g).reshape(1, C2)
    else:
        B2, C2 = B, C
        pred2, tgt2 = pred, target
        cw2 = cw.reshape(1, C2)

    p_bytes = pred2.dtype.itemsize
    t_bytes = tgt2.dtype.itemsize

    LANE = 128
    ROW_G = 32                                # row granularity safe for f32/bf16/int8 tiling
    padded_C = -(-C2 // LANE) * LANE          # lane-padded width (VMEM accounting)

    # Elements per streamed tile so the double-buffered (pred + target) working set
    # stays ~= vmem_io_budget_bytes.
    elem_budget = max(LANE * ROW_G,
                      vmem_io_budget_bytes // (2 * (p_bytes + t_bytes)))

    # ---- column (lane) tiling ----
    col_cap = max(LANE, (max_tile_cols // LANE) * LANE)
    if padded_C <= col_cap and padded_C * ROW_G <= elem_budget:
        TILE_C, tc_pad, n_ct = C2, padded_C, 1
        mask_cols = False
    else:
        TILE_C = min(col_cap, max(LANE, (elem_budget // ROW_G) // LANE * LANE))
        tc_pad, n_ct = TILE_C, -(-C2 // TILE_C)
        mask_cols = (C2 % TILE_C) != 0

    # ---- row (sublane) tiling ----
    rows_budget = max(ROW_G, (elem_budget // tc_pad) // ROW_G * ROW_G)
    if max_tile_rows is not None:
        rows_budget = min(rows_budget, max(ROW_G, (max_tile_rows // ROW_G) * ROW_G))
    if B2 <= rows_budget:
        TILE_B, n_rt = B2, 1
        mask_rows = False
    else:
        TILE_B, n_rt = rows_budget, -(-B2 // rows_budget)
        mask_rows = (B2 % TILE_B) != 0

    num_tiles = n_rt * n_ct
    kernel = functools.partial(_bce_tile_kernel, padding_value, B2, C2,
                               mask_rows, mask_cols)

    n_elems = B * C
    partials = pl.pallas_call(
        kernel,
        out_shape=jax.ShapeDtypeStruct((8 * num_tiles, 128), jnp.float32),
        grid_spec=pltpu.PrefetchScalarGridSpec(
            num_scalar_prefetch=0,
            grid=(n_rt, n_ct),
            in_specs=[
                pl.BlockSpec((TILE_B, TILE_C), lambda i, j: (i, j)),
                pl.BlockSpec((TILE_B, TILE_C), lambda i, j: (i, j)),
                pl.BlockSpec((1, TILE_C), lambda i, j: (0, j)),
            ],
            out_specs=pl.BlockSpec((8, 128), lambda i, j, n_ct=n_ct: (i * n_ct + j, 0)),
        ),
        compiler_params=pltpu.CompilerParams(
            dimension_semantics=("parallel", "parallel"),
            vmem_limit_bytes=32 * 1024 * 1024),
        cost_estimate=pl.CostEstimate(
            flops=8 * n_elems,
            transcendentals=2 * n_elems,
            bytes_accessed=n_elems * (p_bytes + t_bytes) + num_tiles * 8 * 128 * 4),
    )(pred2, tgt2, cw2)

    # Tiny final reduction over per-tile partials in plain JAX.
    # (Only rows 0, 8, 16, ... are non-zero; the rest are zeros written by the kernel.)
    return jnp.sum(partials[:, 0]) / jnp.sum(partials[:, 1])


def _reference(pred, target, class_weights, padding_value=-100):
    x = pred.astype(jnp.float32)
    y = target.astype(jnp.float32)
    loss = jnp.maximum(x, 0.0) - x * y + jnp.log1p(jnp.exp(-jnp.abs(x)))
    w = jnp.where(target == 1, class_weights[None, :].astype(jnp.float32), 1.0)
    loss = loss * w
    mask = (~target.astype(jnp.int32)) != padding_value
    return jnp.sum(jnp.where(mask, loss, 0.0)) / jnp.sum(mask.astype(jnp.float32))


if __name__ == "__main__":
    key = jax.random.PRNGKey(0)

    # ---- test 1: small aligned shape; exercises the free lane-dense regroup path ----
    B, C = 8, 32
    k1, k2, k3, key = jax.random.split(key, 4)
    pred = jax.random.normal(k1, (B, C), dtype=jnp.float32)
    target = jax.random.bernoulli(k2, 0.3, (B, C)).astype(jnp.int32)
    pad_mask = jax.random.bernoulli(k3, 0.1, (B, C))
    target = jnp.where(pad_mask, jnp.int32(-100), target)
    class_weights = jnp.linspace(0.5, 2.0, C, dtype=jnp.float32)

    out = jax.block_until_ready(
        bce_with_logits_loss(pred, target, class_weights, padding_value=-100))
    ref = jax.block_until_ready(
        _reference(pred, target, class_weights, padding_value=-100))
    assert jnp.allclose(out, ref, rtol=1e-5, atol=1e-4), (out, ref)

    # ---- test 2: ragged shape + bf16 logits + forced small tiles
    #      -> partial edge blocks masked in-kernel on both grid axes ----
    B, C = 50, 200
    k1, k2, k3, key = jax.random.split(key, 4)
    pred = jax.random.normal(k1, (B, C), dtype=jnp.bfloat16)   # streamed bf16, f32 math in-kernel
    target = jax.random.bernoulli(k2, 0.3, (B, C)).astype(jnp.int32)
    pad_mask = jax.random.bernoulli(k3, 0.1, (B, C))
    target = jnp.where(pad_mask, jnp.int32(-100), target)
    class_weights = jnp.linspace(0.5, 2.0, C, dtype=jnp.float32)

    out2 = jax.block_until_ready(
        bce_with_logits_loss(pred, target, class_weights, padding_value=-100,
                             max_tile_rows=32, max_tile_cols=128))
    ref2 = jax.block_until_ready(
        _reference(pred, target, class_weights, padding_value=-100))
    assert jnp.allclose(out2, ref2, rtol=1e-3, atol=1e-3), (out2, ref2)

    print("KERNEL_OK")
</pallas_src>

<mosaic_0001>
module attributes {stable_mosaic.version = 11 : i64} {
  func.func @_bce_tile_kernel(%arg0: i32, %arg1: i32, %arg2: memref<2x128xf32, #tpu.memory_space<vmem>>, %arg3: memref<2x128xi32, #tpu.memory_space<vmem>>, %arg4: memref<1x128xf32, #tpu.memory_space<vmem>>, %arg5: memref<8x128xf32, #tpu.memory_space<vmem>>) attributes {dimension_semantics = [#tpu.dimension_semantics<parallel>, #tpu.dimension_semantics<parallel>], iteration_bounds = array<i64: 1, 1>, scalar_prefetch = 0 : i64, scratch_operands = 0 : i64, tpu.core_type = #tpu.core_type<tc>, window_params = [{transform_indices = @transform_0, window_bounds = array<i64: 2, 128>}, {transform_indices = @transform_1, window_bounds = array<i64: 2, 128>}, {transform_indices = @transform_2, window_bounds = array<i64: 1, 128>}, {transform_indices = @transform_3, window_bounds = array<i64: 8, 128>}]} {
    %c0 = arith.constant 0 : index
    %c0_0 = arith.constant 0 : index
    %0 = vector.load %arg2[%c0, %c0_0] : memref<2x128xf32, #tpu.memory_space<vmem>>, vector<2x128xf32>
    %c0_1 = arith.constant 0 : index
    %c0_2 = arith.constant 0 : index
    %1 = vector.load %arg3[%c0_1, %c0_2] : memref<2x128xi32, #tpu.memory_space<vmem>>, vector<2x128xi32>
    %2 = arith.sitofp %1 : vector<2x128xi32> to vector<2x128xf32>
    %cst = arith.constant 0.000000e+00 : f32
    %3 = vector.broadcast %cst : f32 to vector<2x128xf32>
    %4 = arith.maximumf %0, %3 : vector<2x128xf32>
    %5 = arith.mulf %0, %2 : vector<2x128xf32>
    %6 = arith.subf %4, %5 : vector<2x128xf32>
    %7 = math.absf %0 : vector<2x128xf32>
    %cst_3 = arith.constant 0.000000e+00 : f32
    %8 = vector.broadcast %cst_3 : f32 to vector<2x128xf32>
    %9 = arith.subf %8, %7 : vector<2x128xf32>
    %10 = math.exp %9 : vector<2x128xf32>
    %11 = math.log1p %10 : vector<2x128xf32>
    %12 = arith.addf %6, %11 : vector<2x128xf32>
    %c1_i32 = arith.constant 1 : i32
    %13 = vector.broadcast %c1_i32 : i32 to vector<2x128xi32>
    %14 = arith.cmpi eq, %1, %13 : vector<2x128xi32>
    %c0_4 = arith.constant 0 : index
    %c0_5 = arith.constant 0 : index
    %15 = vector.load %arg4[%c0_4, %c0_5] : memref<1x128xf32, #tpu.memory_space<vmem>>, vector<1x128xf32>
    %cst_6 = arith.constant 1.000000e+00 : f32
    %16 = vector.shape_cast %15 : vector<1x128xf32> to vector<1x128xf32>
    %17 = vector.broadcast %16 : vector<1x128xf32> to vector<2x128xf32>
    %18 = vector.broadcast %cst_6 : f32 to vector<2x128xf32>
    %19 = arith.select %14, %17, %18 : vector<2x128xi1>, vector<2x128xf32>
    %cst_7 = arith.constant dense<-1> : vector<2x128xi32>
    %20 = arith.xori %1, %cst_7 : vector<2x128xi32>
    %c-100_i32 = arith.constant -100 : i32
    %21 = vector.broadcast %c-100_i32 : i32 to vector<2x128xi32>
    %22 = arith.cmpi ne, %20, %21 : vector<2x128xi32>
    %23 = arith.mulf %12, %19 : vector<2x128xf32>
    %cst_8 = arith.constant 0.000000e+00 : f32
    %24 = vector.broadcast %cst_8 : f32 to vector<2x128xf32>
    %25 = arith.select %22, %23, %24 : vector<2x128xi1>, vector<2x128xf32>
    %26 = vector.shape_cast %25 : vector<2x128xf32> to vector<1x2x128xf32>
    %cst_9 = arith.constant dense<0.000000e+00> : vector<1xf32>
    %27 = vector.multi_reduction <add>, %26, %cst_9 [1, 2] : vector<1x2x128xf32> to vector<1xf32>
    %28 = vector.shape_cast %27 : vector<1xf32> to vector<1x1x1xf32>
    %29 = vector.extract %28[0, 0, 0] : f32 from vector<1x1x1xf32>
    %cst_10 = arith.constant 1.000000e+00 : f32
    %cst_11 = arith.constant 0.000000e+00 : f32
    %30 = vector.broadcast %cst_10 : f32 to vector<2x128xf32>
    %31 = vector.broadcast %cst_11 : f32 to vector<2x128xf32>
    %32 = arith.select %22, %30, %31 : vector<2x128xi1>, vector<2x128xf32>
    %33 = vector.shape_cast %32 : vector<2x128xf32> to vector<1x2x128xf32>
    %cst_12 = arith.constant dense<0.000000e+00> : vector<1xf32>
    %34 = vector.multi_reduction <add>, %33, %cst_12 [1, 2] : vector<1x2x128xf32> to vector<1xf32>
    %35 = vector.shape_cast %34 : vector<1xf32> to vector<1x1x1xf32>
    %36 = vector.extract %35[0, 0, 0] : f32 from vector<1x1x1xf32>
    %37 = tpu.iota {dimensions = array<i32: 0>} : vector<8x128xi32>
    %38 = tpu.iota {dimensions = array<i32: 1>} : vector<8x128xi32>
    %c0_i32 = arith.constant 0 : i32
    %39 = vector.broadcast %c0_i32 : i32 to vector<8x128xi32>
    %40 = arith.cmpi eq, %37, %39 : vector<8x128xi32>
    %c0_i32_13 = arith.constant 0 : i32
    %41 = vector.broadcast %c0_i32_13 : i32 to vector<8x128xi32>
    %42 = arith.cmpi eq, %38, %41 : vector<8x128xi32>
    %43 = arith.andi %40, %42 : vector<8x128xi1>
    %44 = vector.broadcast %29 : f32 to vector<8x128xf32>
    %c0_i32_14 = arith.constant 0 : i32
    %45 = vector.broadcast %c0_i32_14 : i32 to vector<8x128xi32>
    %46 = arith.cmpi eq, %37, %45 : vector<8x128xi32>
    %c1_i32_15 = arith.constant 1 : i32
    %47 = vector.broadcast %c1_i32_15 : i32 to vector<8x128xi32>
    %48 = arith.cmpi eq, %38, %47 : vector<8x128xi32>
    %49 = arith.andi %46, %48 : vector<8x128xi1>
    %50 = vector.broadcast %36 : f32 to vector<8x128xf32>
    %cst_16 = arith.constant 0.000000e+00 : f32
    %51 = vector.broadcast %cst_16 : f32 to vector<8x128xf32>
    %52 = arith.select %49, %50, %51 : vector<8x128xi1>, vector<8x128xf32>
    %53 = arith.select %43, %44, %52 : vector<8x128xi1>, vector<8x128xf32>
    %c0_17 = arith.constant 0 : index
    %c0_18 = arith.constant 0 : index
    %54 = vector.load %arg5[%c0_17, %c0_18] : memref<8x128xf32, #tpu.memory_space<vmem>>, vector<8x128xf32>
    tpu.vector_store %arg5[%c0_17, %c0_18], %53 {strides = array<i32>} : memref<8x128xf32, #tpu.memory_space<vmem>>, vector<8x128xf32>,
    return
  }
  func.func @transform_0(%arg0: i32, %arg1: i32) -> (i32, i32) {
    %c0_i32 = arith.constant 0 : i32
    return %arg0, %arg1 : i32, i32
  }
  func.func @transform_1(%arg0: i32, %arg1: i32) -> (i32, i32) {
    %c0_i32 = arith.constant 0 : i32
    return %arg0, %arg1 : i32, i32
  }
  func.func @transform_2(%arg0: i32, %arg1: i32) -> (i32, i32) {
    %c0_i32 = arith.constant 0 : i32
    %c0_i32_0 = arith.constant 0 : i32
    return %c0_i32, %arg1 : i32, i32
  }
  func.func @transform_3(%arg0: i32, %arg1: i32) -> (i32, i32) {
    %c1_i32 = arith.constant 1 : i32
    %0 = arith.muli %arg0, %c1_i32 : i32
    %1 = arith.addi %0, %arg1 : i32
    %c0_i32 = arith.constant 0 : i32
    %c0_i32_0 = arith.constant 0 : i32
    return %1, %c0_i32 : i32, i32
  }
}

</mosaic_0001>

<bundles_post_ra>
// kernel: tpu_custom_call.1
= control target key start
LH: loop header
LB: loop body
LE: loop exit
PB: predicated region body
PF: predicated region fallthrough
CT: control target
= control target key end

     0   :  { %8 = vsyncpa [#allocation3], 0  ;;  %s228_s0 = inlined_call_operand.hbm [shape: f32[2,128], index: 0, kind: input, shape index: {}]   ;;  %s229_s1 = inlined_call_operand.vmem [shape: s32[2,128], index: 1, kind: input, shape index: {}]   ;;  %s230_s2 = inlined_call_operand.vmem [shape: f32[1,128], index: 2, kind: input, shape index: {}]   ;;  %s231_s3 = inlined_call_operand.hbm [shape: f32[8,128], index: 3, kind: output, shape index: {}]  }
   0x1   :  { %9 = vsyncpa [#allocation4], 0  ;;  %s175_s12 = smov [#allocation2]   ;;  %s127_s16 = scalar_lea.hbm %s228_s0, 32 }
   0x2   :  { %s16_s13 = sshll.u32 %s175_s12, 4  ;;  %p128_p0 = scmp.ne.s32.totalorder %s228_s0, %s127_s16  ;;  %s17_s13 = int_to_ptr.vmem [resolvable:$true] %s16_s13 }
   0x3   :  { %p131_p1 = scmp.lt.u32.totalorder %s127_s16, %s228_s0 }
   0x5   :  { %p133_p2 = pnand %p131_p1, %p128_p0 }
   0x7   :  { %136 = shalt.err (!%p133_p2)
}
   0x8   :  { %s137_s21 = scalar_lea.vmem %s17_s13, 32  ;;  %p142_p4 = scmp.lt.s32.totalorder %s17_s13, %s17_s13 }
   0x9   :  { %p138_p3 = scmp.ne.s32.totalorder %s17_s13, %s137_s21  ;;  %p143_p5 = scmp.lt.s32.totalorder %s137_s21, %s137_s21 }
   0xb   :  { %p144_p6 = por %p143_p5, %p142_p4 }
   0xd   :  { %p145_p7 = pnand %p144_p6, %p138_p3 }
   0xf   :  { %148 = shalt.err (!%p145_p7)
}
  0x10   :  { %19 = dma.hbm_to_vmem [thread:$0]  %s228_s0, 32, %s17_s13, [#allocation3]  }
  0x11   :  { %171 = dma.done.wait [#allocation3], 32  }
  0x12   :  { %172 = vsyncadd [#allocation3], 4294967264  ;;  %v28_v0 = vld [vmem:[#allocation2] sm:$0x3]  ;;  %vm61_vm3 = vcmask 1041408   ;;  %v176_v24 = vmov 0.0   ;;  %v83_v42 = vlaneseq }
  0x13   :  { %v34_v1 = vand.u32 2147483647, %v28_v0  ;;  %v29_v6 = vld [vmem:[%s229_s1] sm:$0x3]  ;;  %v31_v10 = vmax.f32 %v28_v0, 0.0 }
  0x14   :  { %v30_v8 = vcvt.s32.f32 %v29_v6  ;;  %vm48_vm1 = vcmp.eq.s32.totalorder %v29_v6, 1  ;;  %v115_v16 = vld [vmem:[%s230_s2] ss:$0 sm:$0xff]  ;;  %v57_v18 = vxor.u32 4294967295, %v29_v6  ;;  %v84_v43 = vshrl.u32 %v83_v42, 7  ;;  %s177_s2 = smov [#allocation5]  }
  0x15   :  { %v35_v2 = vsub.f32 0.0, %v34_v1  ;;  %v56_v20 = vsel %vm48_vm1, %v115_v16, 1.0  ;;  %v86_v44 = vand.u32 127, %v83_v42  ;;  %s106_s27 = sshll.u32 %s177_s2, 4  ;;  %s107_s27 = int_to_ptr.vmem [resolvable:$true] %s106_s27 }
  0x16   :  { %v32_v11 = vmul.f32 %v30_v8, %v28_v0  ;;  %vm58_vm2 = vcmp.ne.s32.totalorder %v57_v18, 4294967196  ;;  %vm87_vm4 = vcmp.eq.s32.totalorder %v84_v43, 0  ;;  %s149_s29 = scalar_lea.vmem %s107_s27, 128  ;;  %p154_p9 = scmp.lt.s32.totalorder %s107_s27, %s107_s27 }
  0x17   :  { %v36_v3 = vmul.f32 1.442695, %v35_v2  ;;  %v72_v25 = vsel %vm58_vm2, 1.0, %v176_v24  ;;  %vm91_vm5 = vcmp.eq.s32.totalorder %v86_v44, 1  ;;  %vm88_vm6 = vcmp.eq.s32.totalorder %v86_v44, 0  ;;  %p150_p8 = scmp.ne.s32.totalorder %s107_s27, %s149_s29  ;;  %p155_p10 = scmp.lt.s32.totalorder %s149_s29, %s149_s29 }
  0x18   :  { %v33_v15 = vsub.f32 %v31_v10, %v32_v11  ;;  %v73_v27 = vsel %vm61_vm3, %v72_v25, 0.0  ;;  %vm92_vm7 = vmand %vm87_vm4, %vm91_vm5 }
  0x19   :  { %123 = vpow2.f32 %v36_v3  ;;  %vm89_vm8 = vmand %vm87_vm4, %vm88_vm6  ;;  %p156_p11 = por %p155_p10, %p154_p9 }
  0x1b   :  { %p157_p12 = pnand %p156_p11, %p150_p8 }
  0x23   :  { %v124_v4 = vpop.eup %123 }
  0x24   :  { %v38_v5 = vadd.f32 1.0, %v124_v4  ;;  %v41_v7 = vmul.f32 -0.5, %v124_v4  ;;  %v44_v12 = vand.u32 2147483647, %v124_v4 }
  0x26   :  { %125 = vlog2.f32 %v38_v5  ;;  %v42_v9 = vadd.f32 1.0, %v41_v7  ;;  %vm45_vm0 = vcmp.lt.f32.partialorder %v44_v12, 0.0004427343 }
  0x28   :  { %v43_v13 = vmul.f32 %v124_v4, %v42_v9 }
  0x30   :  { %v126_v14 = vpop.eup %125 }
  0x31   :  { %v40_v17 = vmul.f32 0.6931472, %v126_v14 }
  0x33   :  { %v46_v19 = vsel %vm45_vm0, %v43_v13, %v40_v17 }
  0x34   :  { %v47_v21 = vadd.f32 %v46_v19, %v33_v15 }
  0x36   :  { %v59_v22 = vmul.f32 %v56_v20, %v47_v21 }
  0x38   :  { %v60_v23 = vsel %vm58_vm2, %v59_v22, 0.0 }
  0x39   :  { %v62_v26 = vsel %vm61_vm3, %v60_v23, 0.0 }
  0x3a   :  { %63 = vadd.xlane.f32.xlu0 %v62_v26 }
  0x3e   :  { %74 = vadd.xlane.f32.xlu0 %v73_v27 }
  0xc7   :  { %v64_v28 = vpop.xlane.xlu0 %63 }
  0xc8   :  { %v65_v29 = vrot.slane %v64_v28, 4 }
  0xca   :  { %v66_v30 = vadd.f32 %v65_v29, %v64_v28 }
  0xcb   :  { %v75_v31 = vpop.xlane.xlu0 %74 }
  0xcc   :  { %v67_v32 = vrot.slane %v66_v30, 2  ;;  %v76_v33 = vrot.slane %v75_v31, 4 }
  0xce   :  { %v77_v34 = vadd.f32 %v76_v33, %v75_v31  ;;  %v68_v35 = vadd.f32 %v67_v32, %v66_v30 }
  0xd0   :  { %v78_v36 = vrot.slane %v77_v34, 2  ;;  %v69_v37 = vrot.slane %v68_v35, 1 }
  0xd2   :  { %v79_v38 = vadd.f32 %v78_v36, %v77_v34  ;;  %v70_v39 = vadd.f32 %v69_v37, %v68_v35 }
  0xd4   :  { %116 = vpush %v70_v39  ;;  %v80_v40 = vrot.slane %v79_v38, 1 }
  0xd6   :  { %v81_v41 = vadd.f32 %v80_v40, %v79_v38 }
  0xd8   :  { %118 = vpush %v81_v41 }
 0x105   :  { %s117_s1 = spop %116 }
 0x106   :  { %v90_v46 = vstv %s117_s1 }
 0x109   :  { %s119_s28 = spop %118 }
 0x10a   :  { %v93_v45 = vstv %s119_s28 }
 0x10b   :  { %v94_v47 = vsel %vm92_vm7, %v93_v45, 0.0 }
 0x10c   :  { %v95_v48 = vsel %vm89_vm8, %v90_v46, %v94_v47 }
 0x10d   :  { %96 = vst [vmem:[#allocation5] sm:$0xff] %v95_v48 }
 0x10e   :  { %160 = shalt.err (!%p157_p12)
}
 0x10f   :  { %s161_s5 = scalar_lea.hbm %s231_s3, 128 }
 0x110   :  { %p162_p13 = scmp.ne.s32.totalorder %s231_s3, %s161_s5  ;;  %p165_p0 = scmp.lt.u32.totalorder %s161_s5, %s231_s3 }
 0x112   :  { %p167_p1 = pnand %p165_p0, %p162_p13 }
 0x114   :  { %170 = shalt.err (!%p167_p1)
}
 0x115   :  { %109 = dma.vmem_to_hbm [thread:$0]  %s107_s27, 128, %s231_s3, [#allocation4]  }
 0x116   :  { %173 = dma.done.wait [#allocation4], 128  }
 0x117   :  { %174 = vsyncadd [#allocation4], 4294967168 }
 0x118   :  { %113 = vsyncpa [#allocation3], 1 }
 0x119   :  { %114 = vsyncpa [#allocation4], 1 }

</bundles_post_ra>
